<compile_context>
chip_gen: v7x
topology: tpu7x:2x2x1
jax: 0.10.0
libtpu: 0.0.40
codegen_flags: <defaults>
</compile_context>

<pallas_src>
import jax
import jax.numpy as jnp
from jax.experimental import pallas as pl
from jax.experimental.pallas import tpu as pltpu


def _col_shift_wide(v, width):
    """Column-neighbour views of a spatially-flattened (C, L) tile.

    left[:, i]  = v[:, i-1]  (0 where col == 0)
    right[:, i] = v[:, i+1]  (0 where col == width-1)
    Uses XLU lane rotates (pltpu.roll) + one-lane boundary masks instead of
    unaligned lane slices.
    """
    n = v.shape[-1]
    col = jax.lax.broadcasted_iota(jnp.int32, (1, n), 1) % width
    left = jnp.where(col == 0, 0.0, pltpu.roll(v, shift=1, axis=1))
    right = jnp.where(col == width - 1, 0.0, pltpu.roll(v, shift=n - 1, axis=1))
    return left, right


def _col_shift_small(v):
    """Column-neighbour shifts (zero padded) for a small (C, W) halo row."""
    c = v.shape[0]
    z = jnp.zeros((c, 1), v.dtype)
    left = jnp.concatenate([z, v[:, :-1]], axis=1)
    right = jnp.concatenate([v[:, 1:], z], axis=1)
    return left, right


def _make_kernel(Cin, Cout, H, W, TH):
    L = TH * W
    n_tiles = H // TH

    def kernel(xb_ref, x_hbm, dww_ref, dwb_ref, pww_ref, pwb_ref,
               o_ref, halo, sem):
        b = pl.program_id(0)
        t = pl.program_id(1)
        h0 = t * TH

        # ---- tiny halo-row DMAs (top / bottom neighbour rows of this tile) ----
        if n_tiles > 1:
            top_off = jnp.maximum(h0 - 1, 0) * W        # clamped; unused at t == 0
            bot_off = jnp.minimum(h0 + TH, H - 1) * W   # clamped; unused at t == last

            def top_copy():
                return pltpu.make_async_copy(
                    x_hbm.at[b, :, pl.ds(top_off, W)], halo.at[0], sem.at[0])

            def bot_copy():
                return pltpu.make_async_copy(
                    x_hbm.at[b, :, pl.ds(bot_off, W)], halo.at[1], sem.at[1])

            @pl.when(t > 0)
            def _():
                top_copy().start()

            @pl.when(t < n_tiles - 1)
            def _():
                bot_copy().start()

            @pl.when(t == 0)
            def _():
                halo[0, :, :] = jnp.zeros((Cin, W), halo.dtype)

            @pl.when(t == n_tiles - 1)
            def _():
                halo[1, :, :] = jnp.zeros((Cin, W), halo.dtype)

        # ---- small resident parameters (read before any DMA wait) -------------
        w = dww_ref[...]                    # (Cin, 9)  f32, taps row-major
        dwb = dwb_ref[...]                  # (Cin, 1)
        pww = pww_ref[...]                  # (Cout, Cin)
        pwb = pwb_ref[...]                  # (Cout, 1)

        # ---- depthwise 3x3 over the flattened core tile (all Cin at once) -----
        xc = xb_ref[0].astype(jnp.float32)  # (Cin, L), channels on sublanes
        xl, xr = _col_shift_wide(xc, W)

        lane = jax.lax.broadcasted_iota(jnp.int32, (1, L), 1)
        first_row = lane < W                # output rows whose "row above" is off-tile
        last_row = lane >= L - W            # output rows whose "row below" is off-tile

        # centre row taps (di == 1), bias folded into the init (no zeros pass)
        acc = xc * w[:, 4:5] + dwb
        acc = acc + xl * w[:, 3:4] + xr * w[:, 5:6]
        # row above (di == 0): shift down one row; off-tile row masked to zero
        for dj, xs in enumerate((xl, xc, xr)):
            up = pltpu.roll(xs, shift=W, axis=1)
            acc = acc + jnp.where(first_row, 0.0, up) * w[:, dj:dj + 1]
        # row below (di == 2): shift up one row
        for dj, xs in enumerate((xl, xc, xr)):
            dn = pltpu.roll(xs, shift=L - W, axis=1)
            acc = acc + jnp.where(last_row, 0.0, dn) * w[:, 6 + dj:7 + dj]

        # ---- pointwise 1x1, all Cout at once (sublane / lane dense) ------------
        out = jnp.broadcast_to(acc[0:1, :], (Cout, L)) * pww[:, 0:1] + pwb
        for ci in range(1, Cin):
            out = out + jnp.broadcast_to(acc[ci:ci + 1, :], (Cout, L)) * pww[:, ci:ci + 1]
        o_ref[0] = out.astype(o_ref.dtype)

        # ---- cross-tile halo corrections on the first / last output row --------
        if n_tiles > 1:
            @pl.when(t > 0)
            def _():
                top_copy().wait()

            @pl.when(t < n_tiles - 1)
            def _():
                bot_copy().wait()

            ht = halo[0].astype(jnp.float32)     # row h0-1   (zeros at image top)
            hb = halo[1].astype(jnp.float32)     # row h0+TH  (zeros at image bottom)
            htl, htr = _col_shift_small(ht)
            hbl, hbr = _col_shift_small(hb)
            top_dw = htl * w[:, 0:1] + ht * w[:, 1:2] + htr * w[:, 2:3]   # (Cin, W)
            bot_dw = hbl * w[:, 6:7] + hb * w[:, 7:8] + hbr * w[:, 8:9]

            top_pw = jnp.broadcast_to(top_dw[0:1, :], (Cout, W)) * pww[:, 0:1]
            bot_pw = jnp.broadcast_to(bot_dw[0:1, :], (Cout, W)) * pww[:, 0:1]
            for ci in range(1, Cin):
                top_pw = top_pw + jnp.broadcast_to(top_dw[ci:ci + 1, :], (Cout, W)) * pww[:, ci:ci + 1]
                bot_pw = bot_pw + jnp.broadcast_to(bot_dw[ci:ci + 1, :], (Cout, W)) * pww[:, ci:ci + 1]

            o_ref[0, :, 0:W] = (o_ref[0, :, 0:W].astype(jnp.float32)
                                + top_pw).astype(o_ref.dtype)
            o_ref[0, :, L - W:L] = (o_ref[0, :, L - W:L].astype(jnp.float32)
                                    + bot_pw).astype(o_ref.dtype)

    return kernel


def _vmem_capacity_bytes():
    try:
        return int(pltpu.get_tpu_info().vmem_capacity_bytes)
    except Exception:
        return 64 * 1024 * 1024            # conservative (v7x-sized) default


def _pick_tile_h(H, W, Cin, Cout, in_isz, out_isz, n_batch, budget_bytes):
    """Largest row tile TH (dividing H, with TH*W % 128 == 0 or TH == H) whose
    per-step working set fits the budget; prefers >=2 total grid points."""
    cands = [H] + [th for th in range(H - 1, 0, -1)
                   if H % th == 0 and (th * W) % 128 == 0]

    def step_bytes(th):
        l = th * W
        return (2 * Cin * l * in_isz          # double-buffered input blocks
                + 2 * Cout * l * out_isz      # double-buffered output blocks
                + 6 * (Cin + Cout) * l * 4)   # f32 temporaries (rough)

    th = next((c for c in cands if step_bytes(c) <= budget_bytes), cands[-1])
    if n_batch * (H // th) < 2:               # keep both v7x TensorCores busy
        for c in cands:
            if H // c >= 2 and step_bytes(c) <= budget_bytes:
                th = c
                break
    return th


def depthwise_conv2d(x, dw_w, dw_b, pw_w, pw_b, *, padding=1, tile_h=None):
    """Equivalent of Depthwise_Conv2D.forward (kernel 3x3, stride 1, padding 1).

    x    : (N, Cin, H, W)     NCHW (like PyTorch)
    dw_w : (Cin, 1, 3, 3)     depthwise weight,  dw_b : (Cin,)
    pw_w : (Cout, Cin, 1, 1)  1x1 weight,        pw_b : (Cout,)
    returns (N, Cout, H, W)   NCHW
    """
    N, Cin, H, W = x.shape
    Cout = pw_w.shape[0]
    KH, KW = int(dw_w.shape[2]), int(dw_w.shape[3])
    if (KH, KW) != (3, 3) or padding != 1:
        raise NotImplementedError("kernel specialized to 3x3 / stride 1 / padding 1")
    # TODO(synk): add W tiling for very large W (currently a full row-slab per step).

    cap = _vmem_capacity_bytes()
    if tile_h is None:
        tile_h = _pick_tile_h(H, W, Cin, Cout, x.dtype.itemsize, x.dtype.itemsize,
                              N, budget_bytes=cap // 3)
    assert H % tile_h == 0, "tile_h must divide H"
    assert tile_h == H or (tile_h * W) % 128 == 0, \
        "tile_h*W must be a multiple of 128 (or tile_h == H)"

    L = tile_h * W
    HW = H * W
    x_flat = x.reshape(N, Cin, HW)            # free: trailing-dim merge, stays NCHW

    dww = dw_w.reshape(Cin, KH * KW).astype(jnp.float32)    # (Cin, 9)
    dwb = dw_b.reshape(Cin, 1).astype(jnp.float32)
    pww = pw_w.reshape(Cout, Cin).astype(jnp.float32)
    pwb = pw_b.reshape(Cout, 1).astype(jnp.float32)

    kernel = _make_kernel(Cin, Cout, H, W, tile_h)
    vmem_limit = max(32 << 20, min((cap * 3) // 4, 96 << 20))

    out_flat = pl.pallas_call(
        kernel,
        out_shape=jax.ShapeDtypeStruct((N, Cout, HW), x.dtype),
        grid_spec=pltpu.PrefetchScalarGridSpec(
            num_scalar_prefetch=0,
            grid=(N, H // tile_h),
            in_specs=[
                # core rows: auto-pipelined, lane-dense (last dim = tile_h*W)
                pl.BlockSpec((1, Cin, L), lambda b, t: (b, 0, t)),
                # same tensor again, left in HBM for the tiny halo-row DMAs
                pl.BlockSpec(memory_space=pl.ANY),
                # small resident parameters (full arrays, constant index map)
                pl.BlockSpec((Cin, KH * KW), lambda b, t: (0, 0)),
                pl.BlockSpec((Cin, 1), lambda b, t: (0, 0)),
                pl.BlockSpec((Cout, Cin), lambda b, t: (0, 0)),
                pl.BlockSpec((Cout, 1), lambda b, t: (0, 0)),
            ],
            out_specs=pl.BlockSpec((1, Cout, L), lambda b, t: (b, 0, t)),
            scratch_shapes=[
                pltpu.VMEM((2, Cin, W), x.dtype),           # top / bottom halo rows
                pltpu.SemaphoreType.DMA((2,)),
            ],
        ),
        compiler_params=pltpu.CompilerParams(
            dimension_semantics=("parallel", "parallel"),
            vmem_limit_bytes=int(vmem_limit),
        ),
    )(x_flat, x_flat, dww, dwb, pww, pwb)

    return out_flat.reshape(N, Cout, H, W)


def _reference(x_nchw, dw_w, dw_b, pw_w, pw_b, padding=1):
    """Pure-JAX reference using lax.conv_general_dilated (NCHW, like PyTorch)."""
    Cin = x_nchw.shape[1]
    y = jax.lax.conv_general_dilated(
        x_nchw, dw_w, window_strides=(1, 1),
        padding=((padding, padding), (padding, padding)),
        feature_group_count=Cin,
        dimension_numbers=("NCHW", "OIHW", "NCHW"),
    ) + dw_b[None, :, None, None]
    out = jax.lax.conv_general_dilated(
        y, pw_w, window_strides=(1, 1), padding=((0, 0), (0, 0)),
        dimension_numbers=("NCHW", "OIHW", "NCHW"),
    ) + pw_b[None, :, None, None]
    return out


if __name__ == "__main__":
    key = jax.random.PRNGKey(0)
    k_x, k_dw, k_db, k_pw, k_pb = jax.random.split(key, 5)

    N, Cin, H, W = 2, 4, 16, 16
    Cout = 8

    x = jax.random.normal(k_x, (N, Cin, H, W), dtype=jnp.float32)
    dw_w = jax.random.normal(k_dw, (Cin, 1, 3, 3), dtype=jnp.float32) * 0.2
    dw_b = jax.random.normal(k_db, (Cin,), dtype=jnp.float32) * 0.1
    pw_w = jax.random.normal(k_pw, (Cout, Cin, 1, 1), dtype=jnp.float32) * 0.2
    pw_b = jax.random.normal(k_pb, (Cout,), dtype=jnp.float32) * 0.1

    ref = _reference(x, dw_w, dw_b, pw_w, pw_b, padding=1)

    # default tile (full image per step): grid (2, 1) — still 2 parallel points
    out_full = jax.block_until_ready(depthwise_conv2d(x, dw_w, dw_b, pw_w, pw_b))
    assert out_full.shape == (N, Cout, H, W)
    assert jnp.allclose(out_full, ref, atol=1e-4, rtol=1e-4), "mismatch (full tile)"

    # row-tiled path: grid (2, 2), exercises the halo DMAs + edge-row corrections
    out_tiled = jax.block_until_ready(
        depthwise_conv2d(x, dw_w, dw_b, pw_w, pw_b, tile_h=8))
    assert jnp.allclose(out_tiled, ref, atol=1e-4, rtol=1e-4), "mismatch (tiled)"

    print("KERNEL_OK")
</pallas_src>

<mosaic_0001>
module attributes {stable_mosaic.version = 11 : i64} {
  func.func @kernel(%arg0: i32, %arg1: i32, %arg2: memref<1x4x256xf32, #tpu.memory_space<vmem>>, %arg3: memref<2x4x256xf32, #tpu.memory_space<any>>, %arg4: memref<4x9xf32, #tpu.memory_space<vmem>>, %arg5: memref<4x1xf32, #tpu.memory_space<vmem>>, %arg6: memref<8x4xf32, #tpu.memory_space<vmem>>, %arg7: memref<8x1xf32, #tpu.memory_space<vmem>>, %arg8: memref<1x8x256xf32, #tpu.memory_space<vmem>>, %arg9: memref<2x4x16xf32, #tpu.memory_space<vmem>>, %arg10: memref<2x!tpu.dma_semaphore, #tpu.memory_space<semaphore_mem>>) attributes {dimension_semantics = [#tpu.dimension_semantics<parallel>, #tpu.dimension_semantics<parallel>], iteration_bounds = array<i64: 2, 1>, scalar_prefetch = 0 : i64, scratch_operands = 2 : i64, tpu.core_type = #tpu.core_type<tc>, window_params = [{transform_indices = @transform_0, window_bounds = array<i64: 1, 4, 256>}, {}, {pipeline_mode = #tpu.pipeline_mode<synchronous>, transform_indices = @transform_2, window_bounds = array<i64: 4, 9>}, {pipeline_mode = #tpu.pipeline_mode<synchronous>, transform_indices = @transform_3, window_bounds = array<i64: 4, 1>}, {pipeline_mode = #tpu.pipeline_mode<synchronous>, transform_indices = @transform_4, window_bounds = array<i64: 8, 4>}, {pipeline_mode = #tpu.pipeline_mode<synchronous>, transform_indices = @transform_5, window_bounds = array<i64: 8, 1>}, {transform_indices = @transform_6, window_bounds = array<i64: 1, 8, 256>}]} {
    %c0 = arith.constant 0 : index
    %c0_0 = arith.constant 0 : index
    %0 = vector.load %arg4[%c0, %c0_0] : memref<4x9xf32, #tpu.memory_space<vmem>>, vector<4x9xf32>
    %c0_1 = arith.constant 0 : index
    %c0_2 = arith.constant 0 : index
    %1 = vector.load %arg5[%c0_1, %c0_2] : memref<4x1xf32, #tpu.memory_space<vmem>>, vector<4x1xf32>
    %c0_3 = arith.constant 0 : index
    %c0_4 = arith.constant 0 : index
    %2 = vector.load %arg6[%c0_3, %c0_4] : memref<8x4xf32, #tpu.memory_space<vmem>>, vector<8x4xf32>
    %c0_5 = arith.constant 0 : index
    %c0_6 = arith.constant 0 : index
    %3 = vector.load %arg7[%c0_5, %c0_6] : memref<8x1xf32, #tpu.memory_space<vmem>>, vector<8x1xf32>
    %c0_7 = arith.constant 0 : index
    %c0_8 = arith.constant 0 : index
    %c0_9 = arith.constant 0 : index
    %4 = vector.load %arg2[%c0_7, %c0_8, %c0_9] : memref<1x4x256xf32, #tpu.memory_space<vmem>>, vector<1x4x256xf32>
    %5 = vector.shape_cast %4 : vector<1x4x256xf32> to vector<4x256xf32>
    %6 = tpu.iota {dimensions = array<i32: 1>} : vector<1x256xi32>
    %c16_i32 = arith.constant 16 : i32
    %c0_i32 = arith.constant 0 : i32
    %7 = arith.cmpi eq, %c16_i32, %c0_i32 : i32
    %c1_i32 = arith.constant 1 : i32
    %8 = arith.select %7, %c1_i32, %c16_i32 : i32
    %9 = vector.broadcast %8 : i32 to vector<1x256xi32>
    %10 = arith.remsi %6, %9 : vector<1x256xi32>
    %c0_i32_10 = arith.constant 0 : i32
    %11 = vector.broadcast %c0_i32_10 : i32 to vector<1x256xi32>
    %12 = arith.cmpi ne, %10, %11 : vector<1x256xi32>
    %c0_i32_11 = arith.constant 0 : i32
    %13 = vector.broadcast %c0_i32_11 : i32 to vector<1x256xi32>
    %14 = arith.cmpi slt, %10, %13 : vector<1x256xi32>
    %c0_i32_12 = arith.constant 0 : i32
    %15 = arith.cmpi slt, %8, %c0_i32_12 : i32
    %16 = vector.broadcast %15 : i1 to vector<1x256xi1>
    %17 = vector.broadcast %16 : vector<1x256xi1> to vector<1x256xi1>
    %18 = arith.xori %14, %17 : vector<1x256xi1>
    %19 = arith.andi %18, %12 : vector<1x256xi1>
    %20 = vector.broadcast %8 : i32 to vector<1x256xi32>
    %21 = arith.addi %10, %20 : vector<1x256xi32>
    %22 = arith.select %19, %21, %10 : vector<1x256xi1>, vector<1x256xi32>
    %c0_i32_13 = arith.constant 0 : i32
    %23 = vector.broadcast %c0_i32_13 : i32 to vector<1x256xi32>
    %24 = arith.cmpi eq, %22, %23 : vector<1x256xi32>
    %c1_i32_14 = arith.constant 1 : i32
    %25 = tpu.dynamic_rotate %5 by %c1_i32_14 dim 1 : vector<4x256xf32>, i32 -> vector<4x256xf32>
    %cst = arith.constant 0.000000e+00 : f32
    %26 = vector.shape_cast %24 : vector<1x256xi1> to vector<1x256xi1>
    %27 = vector.broadcast %26 : vector<1x256xi1> to vector<4x256xi1>
    %28 = vector.broadcast %cst : f32 to vector<4x256xf32>
    %29 = arith.select %27, %28, %25 : vector<4x256xi1>, vector<4x256xf32>
    %c15_i32 = arith.constant 15 : i32
    %30 = vector.broadcast %c15_i32 : i32 to vector<1x256xi32>
    %31 = arith.cmpi eq, %22, %30 : vector<1x256xi32>
    %c255_i32 = arith.constant 255 : i32
    %32 = tpu.dynamic_rotate %5 by %c255_i32 dim 1 : vector<4x256xf32>, i32 -> vector<4x256xf32>
    %cst_15 = arith.constant 0.000000e+00 : f32
    %33 = vector.shape_cast %31 : vector<1x256xi1> to vector<1x256xi1>
    %34 = vector.broadcast %33 : vector<1x256xi1> to vector<4x256xi1>
    %35 = vector.broadcast %cst_15 : f32 to vector<4x256xf32>
    %36 = arith.select %34, %35, %32 : vector<4x256xi1>, vector<4x256xf32>
    %37 = tpu.iota {dimensions = array<i32: 1>} : vector<1x256xi32>
    %c16_i32_16 = arith.constant 16 : i32
    %38 = vector.broadcast %c16_i32_16 : i32 to vector<1x256xi32>
    %39 = arith.cmpi slt, %37, %38 : vector<1x256xi32>
    %c240_i32 = arith.constant 240 : i32
    %40 = vector.broadcast %c240_i32 : i32 to vector<1x256xi32>
    %41 = arith.cmpi sge, %37, %40 : vector<1x256xi32>
    %42 = vector.extract_strided_slice %0 {offsets = [0, 4], sizes = [4, 1], strides = [1, 1]} : vector<4x9xf32> to vector<4x1xf32>
    %43 = vector.broadcast %42 : vector<4x1xf32> to vector<4x256xf32>
    %44 = arith.mulf %5, %43 : vector<4x256xf32>
    %45 = vector.broadcast %1 : vector<4x1xf32> to vector<4x256xf32>
    %46 = arith.addf %44, %45 : vector<4x256xf32>
    %47 = vector.extract_strided_slice %0 {offsets = [0, 3], sizes = [4, 1], strides = [1, 1]} : vector<4x9xf32> to vector<4x1xf32>
    %48 = vector.broadcast %47 : vector<4x1xf32> to vector<4x256xf32>
    %49 = arith.mulf %29, %48 : vector<4x256xf32>
    %50 = arith.addf %46, %49 : vector<4x256xf32>
    %51 = vector.extract_strided_slice %0 {offsets = [0, 5], sizes = [4, 1], strides = [1, 1]} : vector<4x9xf32> to vector<4x1xf32>
    %52 = vector.broadcast %51 : vector<4x1xf32> to vector<4x256xf32>
    %53 = arith.mulf %36, %52 : vector<4x256xf32>
    %54 = arith.addf %50, %53 : vector<4x256xf32>
    %c16_i32_17 = arith.constant 16 : i32
    %55 = tpu.dynamic_rotate %29 by %c16_i32_17 dim 1 : vector<4x256xf32>, i32 -> vector<4x256xf32>
    %cst_18 = arith.constant 0.000000e+00 : f32
    %56 = vector.shape_cast %39 : vector<1x256xi1> to vector<1x256xi1>
    %57 = vector.broadcast %56 : vector<1x256xi1> to vector<4x256xi1>
    %58 = vector.broadcast %cst_18 : f32 to vector<4x256xf32>
    %59 = arith.select %57, %58, %55 : vector<4x256xi1>, vector<4x256xf32>
    %60 = vector.extract_strided_slice %0 {offsets = [0, 0], sizes = [4, 1], strides = [1, 1]} : vector<4x9xf32> to vector<4x1xf32>
    %61 = vector.broadcast %60 : vector<4x1xf32> to vector<4x256xf32>
    %62 = arith.mulf %59, %61 : vector<4x256xf32>
    %63 = arith.addf %54, %62 : vector<4x256xf32>
    %c16_i32_19 = arith.constant 16 : i32
    %64 = tpu.dynamic_rotate %5 by %c16_i32_19 dim 1 : vector<4x256xf32>, i32 -> vector<4x256xf32>
    %cst_20 = arith.constant 0.000000e+00 : f32
    %65 = vector.shape_cast %39 : vector<1x256xi1> to vector<1x256xi1>
    %66 = vector.broadcast %65 : vector<1x256xi1> to vector<4x256xi1>
    %67 = vector.broadcast %cst_20 : f32 to vector<4x256xf32>
    %68 = arith.select %66, %67, %64 : vector<4x256xi1>, vector<4x256xf32>
    %69 = vector.extract_strided_slice %0 {offsets = [0, 1], sizes = [4, 1], strides = [1, 1]} : vector<4x9xf32> to vector<4x1xf32>
    %70 = vector.broadcast %69 : vector<4x1xf32> to vector<4x256xf32>
    %71 = arith.mulf %68, %70 : vector<4x256xf32>
    %72 = arith.addf %63, %71 : vector<4x256xf32>
    %c16_i32_21 = arith.constant 16 : i32
    %73 = tpu.dynamic_rotate %36 by %c16_i32_21 dim 1 : vector<4x256xf32>, i32 -> vector<4x256xf32>
    %cst_22 = arith.constant 0.000000e+00 : f32
    %74 = vector.shape_cast %39 : vector<1x256xi1> to vector<1x256xi1>
    %75 = vector.broadcast %74 : vector<1x256xi1> to vector<4x256xi1>
    %76 = vector.broadcast %cst_22 : f32 to vector<4x256xf32>
    %77 = arith.select %75, %76, %73 : vector<4x256xi1>, vector<4x256xf32>
    %78 = vector.extract_strided_slice %0 {offsets = [0, 2], sizes = [4, 1], strides = [1, 1]} : vector<4x9xf32> to vector<4x1xf32>
    %79 = vector.broadcast %78 : vector<4x1xf32> to vector<4x256xf32>
    %80 = arith.mulf %77, %79 : vector<4x256xf32>
    %81 = arith.addf %72, %80 : vector<4x256xf32>
    %c240_i32_23 = arith.constant 240 : i32
    %82 = tpu.dynamic_rotate %29 by %c240_i32_23 dim 1 : vector<4x256xf32>, i32 -> vector<4x256xf32>
    %cst_24 = arith.constant 0.000000e+00 : f32
    %83 = vector.shape_cast %41 : vector<1x256xi1> to vector<1x256xi1>
    %84 = vector.broadcast %83 : vector<1x256xi1> to vector<4x256xi1>
    %85 = vector.broadcast %cst_24 : f32 to vector<4x256xf32>
    %86 = arith.select %84, %85, %82 : vector<4x256xi1>, vector<4x256xf32>
    %87 = vector.extract_strided_slice %0 {offsets = [0, 6], sizes = [4, 1], strides = [1, 1]} : vector<4x9xf32> to vector<4x1xf32>
    %88 = vector.broadcast %87 : vector<4x1xf32> to vector<4x256xf32>
    %89 = arith.mulf %86, %88 : vector<4x256xf32>
    %90 = arith.addf %81, %89 : vector<4x256xf32>
    %c240_i32_25 = arith.constant 240 : i32
    %91 = tpu.dynamic_rotate %5 by %c240_i32_25 dim 1 : vector<4x256xf32>, i32 -> vector<4x256xf32>
    %cst_26 = arith.constant 0.000000e+00 : f32
    %92 = vector.shape_cast %41 : vector<1x256xi1> to vector<1x256xi1>
    %93 = vector.broadcast %92 : vector<1x256xi1> to vector<4x256xi1>
    %94 = vector.broadcast %cst_26 : f32 to vector<4x256xf32>
    %95 = arith.select %93, %94, %91 : vector<4x256xi1>, vector<4x256xf32>
    %96 = vector.extract_strided_slice %0 {offsets = [0, 7], sizes = [4, 1], strides = [1, 1]} : vector<4x9xf32> to vector<4x1xf32>
    %97 = vector.broadcast %96 : vector<4x1xf32> to vector<4x256xf32>
    %98 = arith.mulf %95, %97 : vector<4x256xf32>
    %99 = arith.addf %90, %98 : vector<4x256xf32>
    %c240_i32_27 = arith.constant 240 : i32
    %100 = tpu.dynamic_rotate %36 by %c240_i32_27 dim 1 : vector<4x256xf32>, i32 -> vector<4x256xf32>
    %cst_28 = arith.constant 0.000000e+00 : f32
    %101 = vector.shape_cast %41 : vector<1x256xi1> to vector<1x256xi1>
    %102 = vector.broadcast %101 : vector<1x256xi1> to vector<4x256xi1>
    %103 = vector.broadcast %cst_28 : f32 to vector<4x256xf32>
    %104 = arith.select %102, %103, %100 : vector<4x256xi1>, vector<4x256xf32>
    %105 = vector.extract_strided_slice %0 {offsets = [0, 8], sizes = [4, 1], strides = [1, 1]} : vector<4x9xf32> to vector<4x1xf32>
    %106 = vector.broadcast %105 : vector<4x1xf32> to vector<4x256xf32>
    %107 = arith.mulf %104, %106 : vector<4x256xf32>
    %108 = arith.addf %99, %107 : vector<4x256xf32>
    %109 = vector.extract_strided_slice %108 {offsets = [0, 0], sizes = [1, 256], strides = [1, 1]} : vector<4x256xf32> to vector<1x256xf32>
    %110 = vector.shape_cast %109 : vector<1x256xf32> to vector<1x256xf32>
    %111 = vector.broadcast %110 : vector<1x256xf32> to vector<8x256xf32>
    %112 = vector.extract_strided_slice %2 {offsets = [0, 0], sizes = [8, 1], strides = [1, 1]} : vector<8x4xf32> to vector<8x1xf32>
    %113 = vector.broadcast %112 : vector<8x1xf32> to vector<8x256xf32>
    %114 = arith.mulf %111, %113 : vector<8x256xf32>
    %115 = vector.broadcast %3 : vector<8x1xf32> to vector<8x256xf32>
    %116 = arith.addf %114, %115 : vector<8x256xf32>
    %117 = vector.extract_strided_slice %108 {offsets = [1, 0], sizes = [1, 256], strides = [1, 1]} : vector<4x256xf32> to vector<1x256xf32>
    %118 = vector.shape_cast %117 : vector<1x256xf32> to vector<1x256xf32>
    %119 = vector.broadcast %118 : vector<1x256xf32> to vector<8x256xf32>
    %120 = vector.extract_strided_slice %2 {offsets = [0, 1], sizes = [8, 1], strides = [1, 1]} : vector<8x4xf32> to vector<8x1xf32>
    %121 = vector.broadcast %120 : vector<8x1xf32> to vector<8x256xf32>
    %122 = arith.mulf %119, %121 : vector<8x256xf32>
    %123 = arith.addf %116, %122 : vector<8x256xf32>
    %124 = vector.extract_strided_slice %108 {offsets = [2, 0], sizes = [1, 256], strides = [1, 1]} : vector<4x256xf32> to vector<1x256xf32>
    %125 = vector.shape_cast %124 : vector<1x256xf32> to vector<1x256xf32>
    %126 = vector.broadcast %125 : vector<1x256xf32> to vector<8x256xf32>
    %127 = vector.extract_strided_slice %2 {offsets = [0, 2], sizes = [8, 1], strides = [1, 1]} : vector<8x4xf32> to vector<8x1xf32>
    %128 = vector.broadcast %127 : vector<8x1xf32> to vector<8x256xf32>
    %129 = arith.mulf %126, %128 : vector<8x256xf32>
    %130 = arith.addf %123, %129 : vector<8x256xf32>
    %131 = vector.extract_strided_slice %108 {offsets = [3, 0], sizes = [1, 256], strides = [1, 1]} : vector<4x256xf32> to vector<1x256xf32>
    %132 = vector.shape_cast %131 : vector<1x256xf32> to vector<1x256xf32>
    %133 = vector.broadcast %132 : vector<1x256xf32> to vector<8x256xf32>
    %134 = vector.extract_strided_slice %2 {offsets = [0, 3], sizes = [8, 1], strides = [1, 1]} : vector<8x4xf32> to vector<8x1xf32>
    %135 = vector.broadcast %134 : vector<8x1xf32> to vector<8x256xf32>
    %136 = arith.mulf %133, %135 : vector<8x256xf32>
    %137 = arith.addf %130, %136 : vector<8x256xf32>
    %c0_29 = arith.constant 0 : index
    %c0_30 = arith.constant 0 : index
    %c0_31 = arith.constant 0 : index
    %138 = vector.load %arg8[%c0_29, %c0_30, %c0_31] : memref<1x8x256xf32, #tpu.memory_space<vmem>>, vector<1x8x256xf32>
    %139 = vector.shape_cast %138 : vector<1x8x256xf32> to vector<8x256xf32>
    %140 = vector.shape_cast %137 : vector<8x256xf32> to vector<1x8x256xf32>
    tpu.vector_store %arg8[%c0_29, %c0_30, %c0_31], %140 {strides = array<i32>} : memref<1x8x256xf32, #tpu.memory_space<vmem>>, vector<1x8x256xf32>,
    return
  }
  func.func @transform_0(%arg0: i32, %arg1: i32) -> (i32, i32, i32) {
    %c0_i32 = arith.constant 0 : i32
    %c0_i32_0 = arith.constant 0 : i32
    return %arg0, %c0_i32, %arg1 : i32, i32, i32
  }
  func.func @transform_2(%arg0: i32, %arg1: i32) -> (i32, i32) {
    %c0_i32 = arith.constant 0 : i32
    %c0_i32_0 = arith.constant 0 : i32
    %c0_i32_1 = arith.constant 0 : i32
    return %c0_i32, %c0_i32_0 : i32, i32
  }
  func.func @transform_3(%arg0: i32, %arg1: i32) -> (i32, i32) {
    %c0_i32 = arith.constant 0 : i32
    %c0_i32_0 = arith.constant 0 : i32
    %c0_i32_1 = arith.constant 0 : i32
    return %c0_i32, %c0_i32_0 : i32, i32
  }
  func.func @transform_4(%arg0: i32, %arg1: i32) -> (i32, i32) {
    %c0_i32 = arith.constant 0 : i32
    %c0_i32_0 = arith.constant 0 : i32
    %c0_i32_1 = arith.constant 0 : i32
    return %c0_i32, %c0_i32_0 : i32, i32
  }
  func.func @transform_5(%arg0: i32, %arg1: i32) -> (i32, i32) {
    %c0_i32 = arith.constant 0 : i32
    %c0_i32_0 = arith.constant 0 : i32
    %c0_i32_1 = arith.constant 0 : i32
    return %c0_i32, %c0_i32_0 : i32, i32
  }
  func.func @transform_6(%arg0: i32, %arg1: i32) -> (i32, i32, i32) {
    %c0_i32 = arith.constant 0 : i32
    %c0_i32_0 = arith.constant 0 : i32
    return %arg0, %c0_i32, %arg1 : i32, i32, i32
  }
}

</mosaic_0001>

<bundles_post_ra>
// kernel: tpu_custom_call.1
= control target key start
LH: loop header
LB: loop body
LE: loop exit
PB: predicated region body
PF: predicated region fallthrough
CT: control target
= control target key end

     0   :  { %11 = vsyncpa [#allocation5], 0  ;;  %s1160_s0 = inlined_call_operand.vmem [shape: f32[2,4,256], index: 0, kind: input, shape index: {}]   ;;  %s1161_s1 = inlined_call_operand.hbm [shape: f32[2,4,256], index: 1, kind: input, shape index: {}]   ;;  %s1162_s2 = inlined_call_operand.vmem [shape: f32[4,9], index: 2, kind: input, shape index: {}]   ;;  %s1163_s3 = inlined_call_operand.vmem [shape: f32[4,1], index: 3, kind: input, shape index: {}]   ;;  %s1164_s4 = inlined_call_operand.vmem [shape: f32[8,4], index: 4, kind: input, shape index: {}]   ;;  %s1165_s5 = inlined_call_operand.vmem [shape: f32[8,1], index: 5, kind: input, shape index: {}]   ;;  %s1166_s6 = inlined_call_operand.hbm [shape: f32[2,8,256], index: 6, kind: output, shape index: {}]  }
   0x1   :  { %13 = vsyncpa [#allocation5 + $0x1], 0  ;;  %s947_s21 = smov 0   ;;  %s949_s1 = smov 0  }
   0x2   :  { %s951_s22 = smov 0   ;;  %s953_s23 = smov 0  }
   0x3   :  { %s955_s24 = smov 0   ;;  %s957_s25 = smov 0  }
   0x4 LB: > { %s714_s26 = sadd.s32 4294967295, %s895_s25   ;;  %s715_s27 = sadd.s32 4294967294, %s895_s25   ;;  %s895_s25 = sphi %s957_s25, %s19_s25   ;;  %s891_s24 = sphi %s955_s24, %s1173_s24   ;;  %s887_s23 = sphi %s953_s23, %s1172_s23   ;;  %s883_s22 = sphi %s951_s22, %s1171_s22   ;;  %s879_s1 = sphi %s949_s1, %s1170_s1   ;;  %s875_s21 = sphi %s947_s21, %s1169_s21  }
   0x5   : > { %s31_s28 = sadd.s32 1, %s891_s24  ;;  %s152_s29 = sadd.s32 1, %s883_s22 }
   0x6   : > { %p33_p0 = scmp.ge.s32.totalorder %s31_s28, 2  ;;  %p162_p1 = scmp.ne.s32.totalorder %s883_s22, %s879_s1 }
   0x7   : > { %p163_p2 = scmp.eq.s32.totalorder %s714_s26, 1  ;;  %p168_p3 = scmp.ne.s32.totalorder %s879_s1, %s875_s21 }
   0x8   : > { %s1175_s28 = smov (%p33_p0, %s31_s28), 0  ;;  %p169_p5 = scmp.eq.s32.totalorder %s715_s27, 1 }
   0x9   : > { %p987_p4 = por %p163_p2, %p162_p1  ;;  %s147_s7 = ssub.s32 %s891_s24, %s1175_s28 }
   0xa   : > { %p718_p6 = scmp.ge.s32.totalorder %s895_s25, 1  ;;  %p150_p7 = scmp.eq.s32.totalorder %s147_s7, 0 }
   0xb   : > { %p994_p8 = por %p169_p5, %p168_p3  ;;  %p212_p9 = scmp.lt.s32.totalorder %s895_s25, 3 }
   0xc   : > { %s1000_s9 = scalar_select %p150_p7, %s883_s22, %s152_s29  }
   0xd   : > { %p213_p10 = pnand %p718_p6, %p212_p9 }
   0xe   : > { %p245_p11 = scmp.lt.s32.totalorder (!%p213_p10), %s887_s23, 1  ;;  %v897_v0 = vmov (!%p213_p10), 0   ;;  %v898_v1 = vmov (!%p213_p10), 4   ;;  %s899_s15 = smov (!%p213_p10), 127   ;;  %v256_v4 = vld [vmem:[%s1163_s3] sm:$0xf] (!%p213_p10)  ;;  %v260_v13 = vlaneseq (!%p213_p10) }
   0xf   : > { %216 = sbr.rel (%p213_p10) target bundleno = 332 (0x14c), region = 40  ;;  %801 = vset.pattern.permute.xlu1 (!%p213_p10), %v897_v0  ;;  %800 = vset.pattern.permute.xlu0 (!%p213_p10), %v898_v1  ;;  %s900_s16 = smov (!%p213_p10), 1   ;;  %v255_v5 = vld [vmem:[%s1162_s2] sm:$0xf] (!%p213_p10)  ;;  %v901_v6 = vmov (!%p213_p10), 3   ;;  %v902_v7 = vmov (!%p213_p10), 5  }
  0x10   : > { %v903_v8 = vmov (!%p213_p10), 2   ;;  %v904_v9 = vmov (!%p213_p10), 1   ;;  %v905_v10 = vmov (!%p213_p10), 6   ;;  %v906_v11 = vmov (!%p213_p10), 7   ;;  %s907_s26 = smov (!%p213_p10), 16   ;;  %s909_s27 = smov (!%p213_p10), 112  }
  0x11   : > { %v908_v12 = vmov (!%p213_p10), 8   ;;  %v1027_v14 = vand.u32 (!%p213_p10), 127, %v260_v13  ;;  %v257_v27 = vld [vmem:[%s1164_s4] sm:$0xff] (!%p213_p10)  ;;  %v910_v29 = vmov (!%p213_p10), 839922192   ;;  %v1044_v31 = vshrl.u32 (!%p213_p10), %v260_v13, 7 }
  0x12   : > { %v329_v30 = vunpack.c.l.s4 (!%p213_p10), %v910_v29  ;;  %v258_v53 = vld [vmem:[%s1165_s5] sm:$0xff] (!%p213_p10)  ;;  %s241_s12 = sand.u32 (!%p213_p10), 1, %s879_s1  }
  0x13   : > { %v267_v15 = vand.u32 (!%p213_p10), 15, %v1027_v14  ;;  %v1031_v16 = vadd.s32 (!%p213_p10), 128, %v1027_v14  ;;  %vm296_vm0 = vcmp.lt.s32.totalorder (!%p213_p10), %v1027_v14, 1  ;;  %vm311_vm1 = vcmp.lt.s32.totalorder (!%p213_p10), %v1027_v14, 127  ;;  %s719_s13 = sshll.u32 (!%p213_p10), %s241_s12, 4  ;;  %s609_s20 = scalar_lea.sflag (!%p213_p10), [#allocation5], %s241_s12 }
  0x14   : > { %v330_v32 = vunpack.c.0.s8 (!%p213_p10), %v329_v30  ;;  %vm437_vm6 = vcmp.lt.s32.totalorder (!%p213_p10), %v1027_v14, 112  ;;  %vm320_vm8 = vcmp.lt.s32.totalorder (!%p213_p10), %v1027_v14, 16  ;;  %v534_v14 = vsub.s32 (!%p213_p10), 5, %v1044_v31 }
  0x15   : > { %vm287_vm2 = vcmp.eq.s32.totalorder (!%p213_p10), %v267_v15, 0  ;;  %vm305_vm3 = vcmp.eq.s32.totalorder (!%p213_p10), %v267_v15, 15  ;;  %v274_v19 = vand.u32 (!%p213_p10), 15, %v1031_v16  ;;  %vm323_vm7 = vcmp.ge.s32.totalorder (!%p213_p10), %v1031_v16, 240 }
  0x16   : > { %s246_s10 = scalar_select %p245_p11, %s887_s23, 1  ;;  %v333_v35 = vsub.s32 %v330_v32, %v1044_v31  ;;  %v582_v16 = vsub.s32 3, %v1044_v31 }
  0x17   : > { %vm288_vm4 = vcmp.eq.s32.totalorder %v274_v19, 0  ;;  %vm306_vm5 = vcmp.eq.s32.totalorder %v274_v19, 15 }
  0x18   : > { %s729_s11 = sshll.u32 %s246_s10, 3 }
  0x19   : > { %s252_s14 = scalar_lea.vmem %s1160_s0, %s729_s11 }
  0x1a   : > { %v1007_v2 = vld [vmem:[%s252_s14] sm:$0xff]  ;;  %s730_s14 = sshll.u32 %s887_s23, 8 }
  0x1b   : > { %307 = vrot.lane.b32.xlu1 %v1007_v2, %s899_s15  ;;  %292 = vrot.lane.b32.xlu0 %v1007_v2, %s900_s16  ;;  %v290_v3 = vcombine.high %v1007_v2, %v1007_v2  ;;  %s1113_s19 = scalar_lea.hbm %s1166_s6, %s730_s14 }
  0x1f   : > { %309 = vrot.lane.b32.xlu1 %v290_v3, %s899_s15  ;;  %294 = vrot.lane.b32.xlu0 %v290_v3, %s900_s16  ;;  %s243_s15 = scalar_lea.vmem [#allocation4], %s719_s13 }
  0x20   : > { %s625_s16 = sshll.u32 %s243_s15, 4  ;;  %s1115_s16 = int_to_ptr.vmem [resolvable:$true] %s625_s16 }
  0x21   : > { %s817_s23 = scalar_lea.vmem %s1115_s16, 256 }
  0x22   : > { %p818_p12 = scmp.ne.s32.totalorder %s1115_s16, %s817_s23 }
  0x23   : > { %339 = vperm.xlu1 %801, %v256_v4   ;;  %326 = vperm.xlu0 %800, %v255_v5  }
  0x24   : > { %p819_p13 = pnand %p818_p12, %p987_p4 }
  0x26   : > { %p820_p0 = pneg %p819_p13 }
  0x27   : > { %802 = vset.pattern.permute.xlu1 %v901_v6  ;;  %803 = vset.pattern.permute.xlu0 %v902_v7 }
  0x28   : > { %351 = vperm.xlu1 %802, %v255_v5   ;;  %362 = vperm.xlu0 %803, %v255_v5  }
  0x2c   : > { %804 = vset.pattern.permute.xlu1 %v897_v0  ;;  %806 = vset.pattern.permute.xlu0 %v903_v8 }
  0x2d   : > { %385 = vperm.xlu1 %804, %v255_v5   ;;  %423 = vperm.xlu0 %806, %v255_v5  }
  0x31   : > { %805 = vset.pattern.permute.xlu1 %v904_v9  ;;  %807 = vset.pattern.permute.xlu0 %v905_v10 }
  0x32   : > { %404 = vperm.xlu1 %805, %v255_v5   ;;  %447 = vperm.xlu0 %807, %v255_v5  }
  0x36   : > { %808 = vset.pattern.permute.xlu0 %v906_v11  ;;  %395 = vrot.lane.b32.xlu1 %v1007_v2, %s907_s26 }
  0x37   : > { %466 = vperm.xlu0 %808, %v255_v5   ;;  %811 = vset.pattern.permute.xlu1 %v897_v0 }
  0x3a   : > { %397 = vrot.lane.b32.xlu1 %v290_v3, %s907_s26 }
  0x3b   : > { %809 = vset.pattern.permute.xlu0 %v908_v12 }
  0x3c   : > { %485 = vperm.xlu0 %809, %v255_v5  }
  0x3e   : > { %459 = vrot.lane.b32.xlu1 %v290_v3, %s909_s27 }
  0x40   : > { %457 = vrot.lane.b32.xlu0 %v1007_v2, %s909_s27 }
  0x41   : > { %810 = vset.pattern.permute.xlu0 %v897_v0 }
  0x8d   : > { %v293_v17 = vpop.permute.xlu0 %292  ;;  %v308_v18 = vpop.permute.xlu1 %307 }
  0x91   : > { %v295_v20 = vpop.permute.xlu0 %294  ;;  %v310_v21 = vpop.permute.xlu1 %309 }
  0x92   : > { %v298_v22 = vsel %vm296_vm0, %v295_v20, %v293_v17  ;;  %v312_v23 = vsel %vm311_vm1, %v308_v18, %v310_v21  ;;  %v297_v26 = vsel %vm296_vm0, %v293_v17, %v295_v20  ;;  %v313_v33 = vsel %vm311_vm1, %v310_v21, %v308_v18 }
  0x93   : > { %v303_v24 = vsel %vm287_vm2, 0.0, %v298_v22  ;;  %v318_v25 = vsel %vm305_vm3, 0.0, %v312_v23  ;;  %v304_v28 = vsel %vm288_vm4, 0.0, %v297_v26  ;;  %v319_v34 = vsel %vm306_vm5, 0.0, %v313_v33 }
  0x94   : > { %372 = vrot.lane.b32.xlu1 %v303_v24, %s907_s26  ;;  %476 = vrot.lane.b32.xlu0 %v318_v25, %s909_s27 }
  0x98   : > { %374 = vrot.lane.b32.xlu1 %v304_v28, %s907_s26  ;;  %516 = vperm.xlu0 %810, %v257_v27  }
  0x9c   : > { %414 = vrot.lane.b32.xlu1 %v318_v25, %s907_s26  ;;  %813 = vset.pattern.permute.xlu0 %v903_v8 }
  0x9d   : > { %573 = vperm.xlu0 %813, %v257_v27  }
  0xa0   : > { %416 = vrot.lane.b32.xlu1 %v319_v34, %s907_s26  ;;  %s911_s26 = smov [#allocation4]  }
  0xa1   : > { %815 = vset.pattern.permute.xlu0 %v901_v6 }
  0xa2   : > { %v340_v36 = vpop.permute.xlu1 %339  ;;  %v327_v37 = vpop.permute.xlu0 %326 }
  0xa3   : > { %v347_v38 = vrot.slane %v340_v36, %v333_v35  ;;  %v334_v39 = vrot.slane %v327_v37, %v333_v35 }
  0xa4   : > { %433 = vrot.lane.b32.xlu1 %v303_v24, %s909_s27 }
  0xa5   : > { %v336_v40 = vmul.f32 %v334_v39, %v1007_v2 }
  0xa7   : > { %v349_v41 = vadd.f32 %v347_v38, %v336_v40  ;;  %v352_v42 = vpop.permute.xlu1 %351  ;;  %v363_v43 = vpop.permute.xlu0 %362 }
  0xa8   : > { %v354_v44 = vmul.f32 %v352_v42, %v303_v24  ;;  %v355_v45 = vmul.f32 %v352_v42, %v304_v28  ;;  %v365_v46 = vmul.f32 %v363_v43, %v318_v25  ;;  %v366_v47 = vmul.f32 %v363_v43, %v319_v34  ;;  %435 = vrot.lane.b32.xlu1 %v304_v28, %s909_s27 }
  0xaa   : > { %v358_v48 = vcombine.low %v354_v44, %v355_v45  ;;  %v369_v49 = vcombine.low %v365_v46, %v366_v47 }
  0xac   : > { %v360_v50 = vadd.f32 %v358_v48, %v349_v41  ;;  %478 = vrot.lane.b32.xlu1 %v319_v34, %s909_s27  ;;  %v386_v51 = vpop.permute.xlu1 %385  ;;  %v424_v52 = vpop.permute.xlu0 %423  ;;  %s821_s27 = sshll.u32 %s911_s26, 4  ;;  %s822_s27 = int_to_ptr.vmem [resolvable:$false] %s821_s27 }
  0xad   : > { %s823_s29 = scalar_lea.vmem %s822_s27, 512  ;;  %p824_p1 = scmp.lt.s32.totalorder %s1115_s16, %s822_s27 }
  0xae   : > { %v371_v54 = vadd.f32 %v369_v49, %v360_v50  ;;  %v498_v49 = vsub.s32 0, %v1044_v31  ;;  %v502_v50 = vsub.s32 4, %v1044_v31  ;;  %p825_p2 = scmp.lt.s32.totalorder %s823_s29, %s817_s23 }
  0xb0   : > { %523 = vperm.xlu1 %811, %v258_v53   ;;  %v556_v53 = vsub.s32 2, %v1044_v31  ;;  %p826_p3 = por %p825_p2, %p824_p1 }
  0xb1   : > { %v405_v55 = vpop.permute.xlu1 %404  ;;  %v448_v56 = vpop.permute.xlu0 %447 }
  0xb2   : > { %p827_p5 = pnand %p826_p3, %p820_p0 }
  0xb4   : > { %812 = vset.pattern.permute.xlu1 %v904_v9 }
  0xb5   : > { %547 = vperm.xlu1 %812, %v257_v27   ;;  %v396_v57 = vpop.permute.xlu1 %395 }
  0xb6   : > { %v467_v58 = vpop.permute.xlu0 %466 }
  0xb9   : > { %814 = vset.pattern.permute.xlu1 %v901_v6  ;;  %v398_v59 = vpop.permute.xlu1 %397 }
  0xba   : > { %599 = vperm.xlu1 %814, %v257_v27   ;;  %v400_v6 = vsel %vm320_vm8, %v398_v59, %v396_v57  ;;  %v399_v7 = vsel %vm320_vm8, %v396_v57, %v398_v59 }
  0xbb   : > { %v486_v60 = vpop.permute.xlu0 %485  ;;  %v401_v8 = vsel %vm320_vm8, 0.0, %v400_v6  ;;  %v408_v17 = vmul.f32 %v405_v55, %v399_v7 }
  0xbc   : > { %v407_v15 = vmul.f32 %v405_v55, %v401_v8  ;;  %v530_v55 = vsub.s32 1, %v1044_v31 }
  0xbd   : > { %v460_v61 = vpop.permute.xlu1 %459 }
  0xbe   : > { %v411_v21 = vcombine.low %v407_v15, %v408_v17 }
  0xbf   : > { %v458_v62 = vpop.permute.xlu0 %457 }
  0xc0   : > { %v461_v63 = vsel %vm437_vm6, %v458_v62, %v460_v61  ;;  %v462_v0 = vsel %vm437_vm6, %v460_v61, %v458_v62 }
  0xc1   : > { %v464_v1 = vsel %vm323_vm7, 0.0, %v462_v0  ;;  %v469_v2 = vmul.f32 %v467_v58, %v461_v63 }
  0xc2   : > { %v470_v3 = vmul.f32 %v467_v58, %v464_v1 }
  0xc4   : > { %v473_v4 = vcombine.low %v469_v2, %v470_v3 }
 0x106   : > { %v373_v5 = vpop.permute.xlu1 %372  ;;  %v477_v40 = vpop.permute.xlu0 %476 }
 0x10a   : > { %v375_v9 = vpop.permute.xlu1 %374 }
 0x10b   : > { %v376_v10 = vsel %vm320_vm8, %v373_v5, %v375_v9  ;;  %v377_v11 = vsel %vm320_vm8, %v375_v9, %v373_v5 }
 0x10c   : > { %v382_v12 = vsel %vm320_vm8, 0.0, %v377_v11  ;;  %v389_v13 = vmul.f32 %v386_v51, %v376_v10 }
 0x10d   : > { %v388_v18 = vmul.f32 %v386_v51, %v382_v12 }
 0x10e   : > { %v415_v19 = vpop.permute.xlu1 %414 }
 0x10f   : > { %v392_v20 = vcombine.low %v388_v18, %v389_v13 }
 0x111   : > { %v394_v22 = vadd.f32 %v392_v20, %v371_v54  ;;  %v560_v54 = vsub.s32 6, %v1044_v31 }
 0x112   : > { %v417_v23 = vpop.permute.xlu1 %416 }
 0x113   : > { %v413_v24 = vadd.f32 %v411_v21, %v394_v22  ;;  %v418_v25 = vsel %vm320_vm8, %v415_v19, %v417_v23  ;;  %v419_v26 = vsel %vm320_vm8, %v417_v23, %v415_v19 }
 0x114   : > { %v420_v27 = vsel %vm320_vm8, 0.0, %v419_v26  ;;  %v427_v28 = vmul.f32 %v424_v52, %v418_v25 }
 0x115   : > { %v426_v29 = vmul.f32 %v424_v52, %v420_v27 }
 0x116   : > { %v434_v30 = vpop.permute.xlu1 %433 }
 0x117   : > { %v430_v32 = vcombine.low %v426_v29, %v427_v28  ;;  %v517_v10 = vpop.permute.xlu0 %516 }
 0x119   : > { %v432_v33 = vadd.f32 %v430_v32, %v413_v24 }
 0x11a   : > { %v436_v34 = vpop.permute.xlu1 %435 }
 0x11b   : > { %v438_v35 = vsel %vm437_vm6, %v434_v30, %v436_v34  ;;  %v439_v36 = vsel %vm437_vm6, %v436_v34, %v434_v30 }
 0x11c   : > { %v445_v37 = vsel %vm323_vm7, 0.0, %v439_v36  ;;  %v450_v38 = vmul.f32 %v448_v56, %v438_v35  ;;  %v574_v13 = vpop.permute.xlu0 %573 }
 0x11d   : > { %v451_v39 = vmul.f32 %v448_v56, %v445_v37  ;;  %v586_v56 = vsub.s32 7, %v1044_v31 }
 0x11e   : > { %v479_v41 = vpop.permute.xlu1 %478 }
 0x11f   : > { %v454_v42 = vcombine.low %v450_v38, %v451_v39  ;;  %v480_v43 = vsel %vm437_vm6, %v477_v40, %v479_v41  ;;  %v481_v44 = vsel %vm437_vm6, %v479_v41, %v477_v40 }
 0x120   : > { %v483_v45 = vsel %vm323_vm7, 0.0, %v481_v44  ;;  %v488_v46 = vmul.f32 %v486_v60, %v480_v43 }
 0x121   : > { %v456_v47 = vadd.f32 %v454_v42, %v432_v33  ;;  %v489_v48 = vmul.f32 %v486_v60, %v483_v45 }
 0x123   : > { %v475_v51 = vadd.f32 %v473_v4, %v456_v47  ;;  %v492_v52 = vcombine.low %v488_v46, %v489_v48 }
 0x125   : > { %v494_v57 = vadd.f32 %v492_v52, %v475_v51 }
 0x127   : > { %v499_v58 = vrot.slane %v494_v57, %v498_v49  ;;  %v503_v59 = vrot.slane %v494_v57, %v502_v50  ;;  %v557_v60 = vrot.slane %v494_v57, %v556_v53  ;;  %v561_v61 = vrot.slane %v494_v57, %v560_v54 }
 0x128   : > { %v531_v62 = vrot.slane %v494_v57, %v530_v55  ;;  %v535_v63 = vrot.slane %v494_v57, %v534_v14  ;;  %v583_v0 = vrot.slane %v494_v57, %v582_v16  ;;  %v587_v1 = vrot.slane %v494_v57, %v586_v56 }
 0x129   : > { %v509_v2 = vrot.slane %v499_v58, %v498_v49  ;;  %v513_v3 = vrot.slane %v503_v59, %v498_v49  ;;  %v567_v4 = vrot.slane %v557_v60, %v556_v53  ;;  %v571_v5 = vrot.slane %v561_v61, %v556_v53 }
 0x12a   : > { %v541_v6 = vrot.slane %v531_v62, %v530_v55  ;;  %v545_v7 = vrot.slane %v535_v63, %v530_v55  ;;  %v593_v8 = vrot.slane %v583_v0, %v582_v16  ;;  %v597_v9 = vrot.slane %v587_v1, %v582_v16 }
 0x12b   : > { %v519_v11 = vmul.f32 %v517_v10, %v509_v2  ;;  %v520_v12 = vmul.f32 %v517_v10, %v513_v3  ;;  %v576_v21 = vmul.f32 %v574_v13, %v567_v4  ;;  %v577_v22 = vmul.f32 %v574_v13, %v571_v5 }
 0x12f   : > { %v524_v31 = vpop.permute.xlu1 %523 }
 0x130   : > { %v526_v17 = vadd.f32 %v524_v31, %v519_v11  ;;  %v527_v18 = vadd.f32 %v524_v31, %v520_v12 }
 0x134   : > { %v548_v15 = vpop.permute.xlu1 %547 }
 0x135   : > { %v550_v19 = vmul.f32 %v548_v15, %v541_v6  ;;  %v551_v20 = vmul.f32 %v548_v15, %v545_v7 }
 0x137   : > { %v552_v23 = vadd.f32 %v550_v19, %v526_v17  ;;  %v553_v24 = vadd.f32 %v551_v20, %v527_v18 }
 0x139   : > { %v600_v25 = vpop.permute.xlu1 %599  ;;  %v578_v26 = vadd.f32 %v576_v21, %v552_v23  ;;  %v579_v27 = vadd.f32 %v577_v22, %v553_v24 }
 0x13a   : > { %v602_v28 = vmul.f32 %v600_v25, %v593_v8  ;;  %v603_v29 = vmul.f32 %v600_v25, %v597_v9 }
 0x13c   : > { %v604_v30 = vadd.f32 %v602_v28, %v578_v26  ;;  %v605_v32 = vadd.f32 %v603_v29, %v579_v27 }
 0x13e   : > { %606 = vst [vmem:[%s243_s15] sm:$0xff] %v604_v30  ;;  %607 = vst [vmem:[%s243_s15 + $0x8] sm:$0xff] %v605_v32 }
 0x13f   : > { %830 = shalt.err (!%p827_p5)
}
 0x140   : > { %s831_s7 = scalar_lea.hbm %s1113_s19, 256  ;;  %s835_s12 = scalar_lea.hbm %s1166_s6, 512 }
 0x141   : > { %p832_p6 = scmp.ne.s32.totalorder %s1113_s19, %s831_s7  ;;  %p836_p10 = scmp.lt.u32.totalorder %s1113_s19, %s1166_s6 }
 0x142   : > { %p837_p11 = scmp.lt.u32.totalorder %s835_s12, %s831_s7  ;;  %p839_p13 = scmp.lt.u32.totalorder %s831_s7, %s1113_s19 }
 0x143   : > { %p833_p7 = pnand %p832_p6, %p987_p4 }
 0x144   : > { %p838_p12 = por %p837_p11, %p836_p10 }
 0x145   : > { %p834_p9 = pneg %p833_p7 }
 0x146   : > { %p840_p0 = por %p839_p13, %p838_p12 }
 0x148   : > { %p841_p1 = pnand %p840_p0, %p834_p9 }
 0x14a   : > { %844 = shalt.err (!%p841_p1)
}
 0x14b   : > { %731 = dma.vmem_to_hbm [thread:$0]  (%p987_p4), %s1115_s16, 256, %s1113_s19, %s609_s20  }
 0x14c PF: > { %p737_p2 = scmp.ge.s32.totalorder %s895_s25, 2  ;;  %s637_s15 = sand.u32 1, %s875_s21  }
 0x14d   : > { %s638_s17 = scalar_lea.sflag [#allocation5], %s637_s15 }
 0x14e   : > { %p734_p3 = pnand %p737_p2, %p994_p8 }
 0x150   : > { %870 = dma.done.wait (!%p734_p3), %s638_s17, 256  }
 0x151   : > { %872 = vsyncadd (!%p734_p3), %s638_s17, 4294967040  ;;  %s19_s25 = sadd.s32 1, %s895_s25   ;;  %s1169_s21 = smov %s879_s1 }
 0x152   : > { %p16_p5 = scmp.ge.s32.totalorder %s19_s25, 4   ;;  %s1170_s1 = smov %s883_s22 }
 0x153   : > { %s1171_s22 = smov %s1000_s9  ;;  %s1172_s23 = smov %s891_s24 }
 0x154   : > { %s1173_s24 = smov %s1175_s28  ;;  %18 = sbr.rel (!%p16_p5) target bundleno = 4 (0x4), region = 76 }
 0x15b   :  { %643 = vsyncpa [#allocation5], 1 }
 0x15c   :  { %645 = vsyncpa [#allocation5 + $0x1], 1 }
 0x15d   :  { %646 = vsyncmov [#allocation3] }
 0x160   :  { %s647_s30 = vpop.sfrf %646 }
 0x161   :  { %p727_p4 = scmp.ne.s32.totalorder %s647_s30, 0 }
 0x163   :  { %651 = shalt.err (%p727_p4)  }
 0x164   :  { %653 = vsyncmov [#allocation3 + $0x1] }
 0x167   :  { %s654_s8 = vpop.sfrf %653 }
 0x168   :  { %p728_p8 = scmp.ne.s32.totalorder %s654_s8, 0 }
 0x16a   :  { %658 = shalt.err (%p728_p8)  }

</bundles_post_ra>
